<compile_context>
chip_gen: v7x
topology: tpu7x:2x2x1
jax: 0.10.0
libtpu: 0.0.40
codegen_flags: <defaults>
</compile_context>

<pallas_src>
import jax
import jax.numpy as jnp
from jax.experimental import pallas as pl
from jax.experimental.pallas import tpu as pltpu

NUM_CLASSES = 100
NC_PAD = 128          # pad logits to the full 128-lane width (lane-dense stores)
EMB_DIM = 512
HIDDEN = 256


def _round_up(x, m):
    return (x + m - 1) // m * m


def _pick_tk(kp, tk_max):
    """Largest multiple of 128 that divides kp (kp is a 128-multiple) and <= tk_max."""
    n = kp // 128
    d_max = max(1, min(n, tk_max // 128))
    for d in range(d_max, 0, -1):
        if n % d == 0:
            return 128 * d
    return 128


def _facenet_classifier_kernel(x_ref, wemb_ref, w0_ref, b0_ref,
                               w1_ref, b1_ref, o_ref, acc_ref):
    k = pl.program_id(1)

    @pl.when(k == 0)
    def _():
        acc_ref[...] = jnp.zeros_like(acc_ref)

    # --- frozen "facenet" backbone stub: tiled linear projection ---
    # bf16 operands on the MXU, f32 accumulation in VMEM scratch.  x is read
    # once from HBM, so casting here is cheaper than a wrapper-side cast pass.
    acc_ref[...] += jnp.dot(
        x_ref[...].astype(jnp.bfloat16), wemb_ref[...],
        preferred_element_type=jnp.float32)

    # --- epilogue on the last K tile: normalize + classifier head ---
    @pl.when(k == pl.num_programs(1) - 1)
    def _():
        emb = acc_ref[...]
        # L2 normalization (facenet emits unit-norm 512-d embeddings).
        sq = jnp.sum(emb * emb, axis=-1, keepdims=True)
        emb = emb * jax.lax.rsqrt(sq + 1e-12)
        # Linear(512,256) -> ReLU -> Dropout(0.5, identity at eval) -> Linear(256,100)
        # Head weights are bf16 (single MXU pass), accumulation / biases f32.
        h = jnp.dot(emb.astype(jnp.bfloat16), w0_ref[...],
                    preferred_element_type=jnp.float32) + b0_ref[...]
        h = jnp.maximum(h, 0.0)
        out = jnp.dot(h.astype(jnp.bfloat16), w1_ref[...],
                      preferred_element_type=jnp.float32) + b1_ref[...]
        o_ref[...] = out.astype(o_ref.dtype)


def facenet_classifier_forward(images, params, *, tb_max=256, tk_max=8192,
                               vmem_limit_bytes=48 * 1024 * 1024):
    """images: (B, C, H, W) float32 NCHW.  Returns logits (B, NUM_CLASSES)."""
    wemb, w0, b0, w1p, b1p = params  # wemb bf16, pre-padded to Kp rows
    B = images.shape[0]
    x = images.reshape(B, -1)
    if x.dtype != jnp.float32:
        x = x.astype(jnp.float32)
    K = x.shape[1]
    Kp = _round_up(K, 128)
    assert wemb.shape == (Kp, EMB_DIM), (wemb.shape, Kp)

    # Tile sizes.  tk is the largest 128-multiple divisor of Kp (<= tk_max) so
    # that, when K is already a 128-multiple (e.g. 3x160x160 -> 76800, tk=7680),
    # no per-call padding of x is needed and K steps are as few/fat as possible.
    Bp = _round_up(B, 8)
    tb = min(tb_max, Bp)
    Bp = _round_up(Bp, tb)
    tk = _pick_tk(Kp, tk_max)

    # Zero-padding along B / K does not change the matmul result (wemb's padded
    # rows are zero).  For typical inputs this branch is never taken.
    if (Bp, Kp) != (B, K):
        x = jnp.pad(x, ((0, Bp - B), (0, Kp - K)))

    grid = (Bp // tb, Kp // tk)

    flops = 2 * Bp * Kp * EMB_DIM + 2 * Bp * (EMB_DIM * HIDDEN + HIDDEN * NC_PAD)
    bytes_accessed = (Bp * Kp * 4            # x (f32, read once)
                      + Kp * EMB_DIM * 2     # wemb (bf16, streamed per B block)
                      + Bp * NC_PAD * 4      # logits out
                      + EMB_DIM * HIDDEN * 2 + HIDDEN * NC_PAD * 2
                      + (HIDDEN + NC_PAD) * 4)

    logits_padded = pl.pallas_call(
        _facenet_classifier_kernel,
        out_shape=jax.ShapeDtypeStruct((Bp, NC_PAD), jnp.float32),
        grid_spec=pltpu.PrefetchScalarGridSpec(
            num_scalar_prefetch=0,
            grid=grid,
            in_specs=[
                pl.BlockSpec((tb, tk), lambda i, k: (i, k)),           # x tile (f32)
                pl.BlockSpec((tk, EMB_DIM), lambda i, k: (k, 0)),      # wemb tile (bf16)
                pl.BlockSpec((EMB_DIM, HIDDEN), lambda i, k: (0, 0)),  # w0 (resident, bf16)
                pl.BlockSpec((1, HIDDEN), lambda i, k: (0, 0)),        # b0 (resident, f32)
                pl.BlockSpec((HIDDEN, NC_PAD), lambda i, k: (0, 0)),   # w1 (resident, bf16)
                pl.BlockSpec((1, NC_PAD), lambda i, k: (0, 0)),        # b1 (resident, f32)
            ],
            out_specs=pl.BlockSpec((tb, NC_PAD), lambda i, k: (i, 0)),
            scratch_shapes=[pltpu.VMEM((tb, EMB_DIM), jnp.float32)],
        ),
        compiler_params=pltpu.CompilerParams(
            # B axis parallel (megacore), K reduction arbitrary.  Note: for a
            # weight-streaming kernel a K-split across cores would be the real
            # megacore win; B-parallel is harmless here.
            dimension_semantics=("parallel", "arbitrary"),
            vmem_limit_bytes=vmem_limit_bytes,
        ),
        cost_estimate=pl.CostEstimate(
            flops=int(flops),
            transcendentals=int(Bp),
            bytes_accessed=int(bytes_accessed)),
    )(x, wemb, w0, b0, w1p, b1p)

    return logits_padded[:B, :NUM_CLASSES]


def init_params(key, in_features):
    k = jax.random.split(key, 5)
    Kp = _round_up(in_features, 128)
    # TODO(synk): frozen linear stub standing in for pretrained InceptionResnetV1.
    # Pre-padded to Kp rows (zeros) so the forward pass never pads wemb again;
    # bf16 storage halves the dominant HBM stream and is MXU-native.
    wemb = jnp.zeros((Kp, EMB_DIM), jnp.bfloat16)
    wemb = wemb.at[:in_features, :].set(
        (jax.random.normal(k[0], (in_features, EMB_DIM), jnp.float32) * 0.02
         ).astype(jnp.bfloat16))
    w0 = (jax.random.normal(k[1], (EMB_DIM, HIDDEN), jnp.float32) * 0.04
          ).astype(jnp.bfloat16)
    b0 = jax.random.normal(k[2], (1, HIDDEN), jnp.float32) * 0.01
    w1 = jax.random.normal(k[3], (HIDDEN, NUM_CLASSES), jnp.float32) * 0.06
    b1 = jax.random.normal(k[4], (1, NUM_CLASSES), jnp.float32) * 0.01
    # Pad the head output dim to a lane-dense 128 with zero columns.
    w1p = jnp.zeros((HIDDEN, NC_PAD), jnp.bfloat16).at[:, :NUM_CLASSES].set(
        w1.astype(jnp.bfloat16))
    b1p = jnp.zeros((1, NC_PAD), jnp.float32).at[:, :NUM_CLASSES].set(b1)
    return (wemb, w0, b0, w1p, b1p)


if __name__ == "__main__":
    key = jax.random.PRNGKey(0)
    k_img, k_par = jax.random.split(key)

    # Small, deterministic NCHW input (facenet normally takes 3x160x160 faces).
    B, C, H, W = 2, 3, 16, 16
    images = jax.random.normal(k_img, (B, C, H, W), jnp.float32)

    params = init_params(k_par, C * H * W)

    logits = facenet_classifier_forward(images, params)
    jax.block_until_ready(logits)

    assert logits.shape == (B, NUM_CLASSES), logits.shape
    assert logits.dtype == jnp.float32
    assert bool(jnp.all(jnp.isfinite(logits)))
    print("KERNEL_OK")
</pallas_src>

<mosaic_0001>
module attributes {stable_mosaic.version = 11 : i64} {
  func.func @_facenet_classifier_kernel(%arg0: i32, %arg1: i32, %arg2: memref<8x768xf32, #tpu.memory_space<vmem>>, %arg3: memref<768x512xbf16, #tpu.memory_space<vmem>>, %arg4: memref<512x256xbf16, #tpu.memory_space<vmem>>, %arg5: memref<1x256xf32, #tpu.memory_space<vmem>>, %arg6: memref<256x128xbf16, #tpu.memory_space<vmem>>, %arg7: memref<1x128xf32, #tpu.memory_space<vmem>>, %arg8: memref<8x128xf32, #tpu.memory_space<vmem>>, %arg9: memref<8x512xf32, #tpu.memory_space<vmem>>) attributes {dimension_semantics = [#tpu.dimension_semantics<parallel>, #tpu.dimension_semantics<arbitrary>], iteration_bounds = array<i64: 1, 1>, scalar_prefetch = 0 : i64, scratch_operands = 1 : i64, tpu.core_type = #tpu.core_type<tc>, window_params = [{transform_indices = @transform_0, window_bounds = array<i64: 8, 768>}, {transform_indices = @transform_1, window_bounds = array<i64: 768, 512>}, {pipeline_mode = #tpu.pipeline_mode<synchronous>, transform_indices = @transform_2, window_bounds = array<i64: 512, 256>}, {pipeline_mode = #tpu.pipeline_mode<synchronous>, transform_indices = @transform_3, window_bounds = array<i64: 1, 256>}, {pipeline_mode = #tpu.pipeline_mode<synchronous>, transform_indices = @transform_4, window_bounds = array<i64: 256, 128>}, {pipeline_mode = #tpu.pipeline_mode<synchronous>, transform_indices = @transform_5, window_bounds = array<i64: 1, 128>}, {transform_indices = @transform_6, window_bounds = array<i64: 8, 128>}]} {
    %c0_i32 = arith.constant 0 : i32
    %0 = arith.cmpi eq, %arg1, %c0_i32 : i32
    %1 = arith.extui %0 : i1 to i32
    %c0_i32_0 = arith.constant 0 : i32
    %2 = arith.cmpi ne, %1, %c0_i32_0 : i32
    scf.if %2 {
      %cst_10 = arith.constant 0.000000e+00 : f32
      %13 = vector.broadcast %cst_10 : f32 to vector<8x512xf32>
      %c0_11 = arith.constant 0 : index
      %c0_12 = arith.constant 0 : index
      %14 = vector.load %arg9[%c0_11, %c0_12] : memref<8x512xf32, #tpu.memory_space<vmem>>, vector<8x512xf32>
      tpu.vector_store %arg9[%c0_11, %c0_12], %13 {strides = array<i32>} : memref<8x512xf32, #tpu.memory_space<vmem>>, vector<8x512xf32>,
    } else {
    }
    %c0 = arith.constant 0 : index
    %c0_1 = arith.constant 0 : index
    %3 = vector.load %arg9[%c0, %c0_1] : memref<8x512xf32, #tpu.memory_space<vmem>>, vector<8x512xf32>
    %c0_2 = arith.constant 0 : index
    %c0_3 = arith.constant 0 : index
    %4 = vector.load %arg2[%c0_2, %c0_3] : memref<8x768xf32, #tpu.memory_space<vmem>>, vector<8x768xf32>
    %5 = arith.truncf %4 : vector<8x768xf32> to vector<8x768xbf16>
    %c0_4 = arith.constant 0 : index
    %c0_5 = arith.constant 0 : index
    %6 = vector.load %arg3[%c0_4, %c0_5] : memref<768x512xbf16, #tpu.memory_space<vmem>>, vector<768x512xbf16>
    %cst = arith.constant dense<0.000000e+00> : vector<8x512xf32>
    %7 = tpu.matmul %5, %6, %cst {dimension_numbers = #tpu.dot_dimension_numbers<[1], [0], [0], [1], [0, 0, 1, 1], [], []>} : vector<8x768xbf16>, vector<768x512xbf16>, vector<8x512xf32> -> vector<8x512xf32>
    %8 = arith.addf %3, %7 : vector<8x512xf32>
    %c0_6 = arith.constant 0 : index
    %c0_7 = arith.constant 0 : index
    %9 = vector.load %arg9[%c0_6, %c0_7] : memref<8x512xf32, #tpu.memory_space<vmem>>, vector<8x512xf32>
    tpu.vector_store %arg9[%c0_6, %c0_7], %8 {strides = array<i32>} : memref<8x512xf32, #tpu.memory_space<vmem>>, vector<8x512xf32>,
    %c0_i32_8 = arith.constant 0 : i32
    %10 = arith.cmpi eq, %arg1, %c0_i32_8 : i32
    %11 = arith.extui %10 : i1 to i32
    %c0_i32_9 = arith.constant 0 : i32
    %12 = arith.cmpi ne, %11, %c0_i32_9 : i32
    scf.if %12 {
      %c0_10 = arith.constant 0 : index
      %c0_11 = arith.constant 0 : index
      %13 = vector.load %arg9[%c0_10, %c0_11] : memref<8x512xf32, #tpu.memory_space<vmem>>, vector<8x512xf32>
      %14 = arith.mulf %13, %13 : vector<8x512xf32>
      %cst_12 = arith.constant dense<0.000000e+00> : vector<8xf32>
      %15 = vector.multi_reduction <add>, %14, %cst_12 [1] : vector<8x512xf32> to vector<8xf32>
      %16 = vector.shape_cast %15 : vector<8xf32> to vector<8x1xf32>
      %cst_13 = arith.constant 9.99999996E-13 : f32
      %17 = vector.broadcast %cst_13 : f32 to vector<8x1xf32>
      %18 = arith.addf %16, %17 : vector<8x1xf32>
      %19 = math.rsqrt %18 : vector<8x1xf32>
      %20 = vector.broadcast %19 : vector<8x1xf32> to vector<8x512xf32>
      %21 = arith.mulf %13, %20 : vector<8x512xf32>
      %22 = arith.truncf %21 : vector<8x512xf32> to vector<8x512xbf16>
      %c0_14 = arith.constant 0 : index
      %c0_15 = arith.constant 0 : index
      %23 = vector.load %arg4[%c0_14, %c0_15] : memref<512x256xbf16, #tpu.memory_space<vmem>>, vector<512x256xbf16>
      %cst_16 = arith.constant dense<0.000000e+00> : vector<8x256xf32>
      %24 = tpu.matmul %22, %23, %cst_16 {dimension_numbers = #tpu.dot_dimension_numbers<[1], [0], [0], [1], [0, 0, 1, 1], [], []>} : vector<8x512xbf16>, vector<512x256xbf16>, vector<8x256xf32> -> vector<8x256xf32>
      %c0_17 = arith.constant 0 : index
      %c0_18 = arith.constant 0 : index
      %25 = vector.load %arg5[%c0_17, %c0_18] : memref<1x256xf32, #tpu.memory_space<vmem>>, vector<1x256xf32>
      %26 = vector.broadcast %25 : vector<1x256xf32> to vector<8x256xf32>
      %27 = arith.addf %24, %26 : vector<8x256xf32>
      %cst_19 = arith.constant 0.000000e+00 : f32
      %28 = vector.broadcast %cst_19 : f32 to vector<8x256xf32>
      %29 = arith.maximumf %27, %28 : vector<8x256xf32>
      %30 = arith.truncf %29 : vector<8x256xf32> to vector<8x256xbf16>
      %c0_20 = arith.constant 0 : index
      %c0_21 = arith.constant 0 : index
      %31 = vector.load %arg6[%c0_20, %c0_21] : memref<256x128xbf16, #tpu.memory_space<vmem>>, vector<256x128xbf16>
      %cst_22 = arith.constant dense<0.000000e+00> : vector<8x128xf32>
      %32 = tpu.matmul %30, %31, %cst_22 {dimension_numbers = #tpu.dot_dimension_numbers<[1], [0], [0], [1], [0, 0, 1, 1], [], []>} : vector<8x256xbf16>, vector<256x128xbf16>, vector<8x128xf32> -> vector<8x128xf32>
      %c0_23 = arith.constant 0 : index
      %c0_24 = arith.constant 0 : index
      %33 = vector.load %arg7[%c0_23, %c0_24] : memref<1x128xf32, #tpu.memory_space<vmem>>, vector<1x128xf32>
      %34 = vector.broadcast %33 : vector<1x128xf32> to vector<8x128xf32>
      %35 = arith.addf %32, %34 : vector<8x128xf32>
      %c0_25 = arith.constant 0 : index
      %c0_26 = arith.constant 0 : index
      %36 = vector.load %arg8[%c0_25, %c0_26] : memref<8x128xf32, #tpu.memory_space<vmem>>, vector<8x128xf32>
      tpu.vector_store %arg8[%c0_25, %c0_26], %35 {strides = array<i32>} : memref<8x128xf32, #tpu.memory_space<vmem>>, vector<8x128xf32>,
    } else {
    }
    return
  }
  func.func @transform_0(%arg0: i32, %arg1: i32) -> (i32, i32) {
    %c0_i32 = arith.constant 0 : i32
    return %arg0, %arg1 : i32, i32
  }
  func.func @transform_1(%arg0: i32, %arg1: i32) -> (i32, i32) {
    %c0_i32 = arith.constant 0 : i32
    %c0_i32_0 = arith.constant 0 : i32
    return %arg1, %c0_i32 : i32, i32
  }
  func.func @transform_2(%arg0: i32, %arg1: i32) -> (i32, i32) {
    %c0_i32 = arith.constant 0 : i32
    %c0_i32_0 = arith.constant 0 : i32
    %c0_i32_1 = arith.constant 0 : i32
    return %c0_i32, %c0_i32_0 : i32, i32
  }
  func.func @transform_3(%arg0: i32, %arg1: i32) -> (i32, i32) {
    %c0_i32 = arith.constant 0 : i32
    %c0_i32_0 = arith.constant 0 : i32
    %c0_i32_1 = arith.constant 0 : i32
    return %c0_i32, %c0_i32_0 : i32, i32
  }
  func.func @transform_4(%arg0: i32, %arg1: i32) -> (i32, i32) {
    %c0_i32 = arith.constant 0 : i32
    %c0_i32_0 = arith.constant 0 : i32
    %c0_i32_1 = arith.constant 0 : i32
    return %c0_i32, %c0_i32_0 : i32, i32
  }
  func.func @transform_5(%arg0: i32, %arg1: i32) -> (i32, i32) {
    %c0_i32 = arith.constant 0 : i32
    %c0_i32_0 = arith.constant 0 : i32
    %c0_i32_1 = arith.constant 0 : i32
    return %c0_i32, %c0_i32_0 : i32, i32
  }
  func.func @transform_6(%arg0: i32, %arg1: i32) -> (i32, i32) {
    %c0_i32 = arith.constant 0 : i32
    %c0_i32_0 = arith.constant 0 : i32
    return %arg0, %c0_i32 : i32, i32
  }
}

</mosaic_0001>

<bundles_post_ra>
// kernel: tpu_custom_call.1
= control target key start
LH: loop header
LB: loop body
LE: loop exit
PB: predicated region body
PF: predicated region fallthrough
CT: control target
= control target key end

     0   :  { %11 = vsyncpa [#allocation4], 0  ;;  %s3205_s0 = inlined_call_operand.hbm [shape: f32[8,768], index: 0, kind: input, shape index: {}]   ;;  %s3206_s1 = inlined_call_operand.hbm [shape: bf16[768,512], index: 1, kind: input, shape index: {}]   ;;  %s3207_s2 = inlined_call_operand.hbm [shape: bf16[512,256], index: 2, kind: input, shape index: {}]   ;;  %s3208_s3 = inlined_call_operand.vmem [shape: f32[1,256], index: 3, kind: input, shape index: {}]   ;;  %s3209_s4 = inlined_call_operand.hbm [shape: bf16[256,128], index: 4, kind: input, shape index: {}]   ;;  %s3210_s5 = inlined_call_operand.vmem [shape: f32[1,128], index: 5, kind: input, shape index: {}]   ;;  %s3211_s6 = inlined_call_operand.hbm [shape: f32[8,128], index: 6, kind: output, shape index: {}]  }
   0x1   :  { %12 = vsyncpa [#allocation7], 0 }
   0x2   :  { %13 = vsyncpa [#allocation10], 0 }
   0x3   :  { %14 = vsyncpa [#allocation5], 0  ;;  %s3055_s21 = smov [#allocation6]   ;;  %s2937_s25 = scalar_lea.hbm %s3206_s1, 24576 }
   0x4   :  { %s30_s22 = sshll.u32 %s3055_s21, 4  ;;  %p2938_p0 = scmp.ne.s32.totalorder %s3206_s1, %s2937_s25  ;;  %s31_s22 = int_to_ptr.vmem [resolvable:$true] %s30_s22 }
   0x5   :  { %p2941_p1 = scmp.lt.u32.totalorder %s2937_s25, %s3206_s1 }
   0x7   :  { %p2943_p2 = pnand %p2941_p1, %p2938_p0 }
   0x9   :  { %2946 = shalt.err (!%p2943_p2)
}
   0xa   :  { %s2947_s30 = scalar_lea.vmem %s31_s22, 24576  ;;  %p2952_p4 = scmp.lt.s32.totalorder %s31_s22, %s31_s22 }
   0xb   :  { %p2948_p3 = scmp.ne.s32.totalorder %s31_s22, %s2947_s30  ;;  %p2953_p5 = scmp.lt.s32.totalorder %s2947_s30, %s2947_s30 }
   0xd   :  { %p2954_p6 = por %p2953_p5, %p2952_p4 }
   0xf   :  { %p2955_p7 = pnand %p2954_p6, %p2948_p3 }
  0x11   :  { %2958 = shalt.err (!%p2955_p7)
}
  0x12   :  { %s3056_s7 = smov 256   ;;  %s3057_s8 = smov 16  }
  0x13   :  { %36 = dma.hbm_to_vmem [thread:$0]  %s3206_s1, 24576, %s31_s22, [#allocation7], %s3056_s7, %s3056_s7, %s3057_s8  }
  0x14   :  { %s3058_s11 = smov [#allocation3]   ;;  %s3059_s13 = smov [#allocation8]  }
  0x15   :  { %s21_s12 = sshll.u32 %s3058_s11, 4  ;;  %s42_s14 = sshll.u32 %s3059_s13, 4  ;;  %s22_s12 = int_to_ptr.vmem [resolvable:$true] %s21_s12  ;;  %s43_s14 = int_to_ptr.vmem [resolvable:$true] %s42_s14 }
  0x16   :  { %s2959_s17 = scalar_lea.hbm %s3205_s0, 768 }
  0x17   :  { %p2960_p8 = scmp.ne.s32.totalorder %s3205_s0, %s2959_s17  ;;  %p2963_p9 = scmp.lt.u32.totalorder %s2959_s17, %s3205_s0 }
  0x19   :  { %p2965_p10 = pnand %p2963_p9, %p2960_p8 }
  0x1b   :  { %2968 = shalt.err (!%p2965_p10)
}
  0x1c   :  { %s2969_s1 = scalar_lea.vmem %s22_s12, 768  ;;  %p2974_p12 = scmp.lt.s32.totalorder %s22_s12, %s22_s12 }
  0x1d   :  { %p2970_p11 = scmp.ne.s32.totalorder %s22_s12, %s2969_s1  ;;  %p2975_p13 = scmp.lt.s32.totalorder %s2969_s1, %s2969_s1 }
  0x1f   :  { %p2976_p0 = por %p2975_p13, %p2974_p12 }
  0x21   :  { %p2977_p1 = pnand %p2976_p0, %p2970_p11 }
  0x23   :  { %2980 = shalt.err (!%p2977_p1)
}
  0x24   :  { %24 = dma.hbm_to_vmem [thread:$0]  %s3205_s0, 768, %s22_s12, [#allocation4]  }
  0x25   :  { %s2981_s26 = scalar_lea.hbm %s3207_s2, 8192 }
  0x26   :  { %p2982_p2 = scmp.ne.s32.totalorder %s3207_s2, %s2981_s26  ;;  %p2985_p3 = scmp.lt.u32.totalorder %s2981_s26, %s3207_s2 }
  0x28   :  { %p2987_p4 = pnand %p2985_p3, %p2982_p2 }
  0x2a   :  { %2990 = shalt.err (!%p2987_p4)
}
  0x2b   :  { %s2991_s7 = scalar_lea.vmem %s43_s14, 8192  ;;  %p2996_p6 = scmp.lt.s32.totalorder %s43_s14, %s43_s14 }
  0x2c   :  { %p2992_p5 = scmp.ne.s32.totalorder %s43_s14, %s2991_s7  ;;  %p2997_p7 = scmp.lt.s32.totalorder %s2991_s7, %s2991_s7 }
  0x2e   :  { %p2998_p8 = por %p2997_p7, %p2996_p6 }
  0x30   :  { %p2999_p9 = pnand %p2998_p8, %p2992_p5 }
  0x32   :  { %3002 = shalt.err (!%p2999_p9)
}
  0x33   :  { %s3060_s0 = smov 128   ;;  %s3061_s8 = smov 8  }
  0x34   :  { %48 = dma.hbm_to_vmem [thread:$0]  %s3207_s2, 8192, %s43_s14, [#allocation7], %s3060_s0, %s3060_s0, %s3061_s8  }
  0x35   :  { %s3062_s11 = smov [#allocation9]   ;;  %s3003_s16 = scalar_lea.hbm %s3209_s4, 2048 }
  0x36   :  { %s56_s12 = sshll.u32 %s3062_s11, 4  ;;  %p3004_p10 = scmp.ne.s32.totalorder %s3209_s4, %s3003_s16  ;;  %s57_s12 = int_to_ptr.vmem [resolvable:$true] %s56_s12 }
  0x37   :  { %p3007_p11 = scmp.lt.u32.totalorder %s3003_s16, %s3209_s4 }
  0x39   :  { %p3009_p12 = pnand %p3007_p11, %p3004_p10 }
  0x3b   :  { %3012 = shalt.err (!%p3009_p12)
}
  0x3c   :  { %s3013_s21 = scalar_lea.vmem %s57_s12, 2048  ;;  %p3018_p0 = scmp.lt.s32.totalorder %s57_s12, %s57_s12 }
  0x3d   :  { %p3014_p13 = scmp.ne.s32.totalorder %s57_s12, %s3013_s21  ;;  %p3019_p1 = scmp.lt.s32.totalorder %s3013_s21, %s3013_s21 }
  0x3f   :  { %p3020_p2 = por %p3019_p1, %p3018_p0 }
  0x41   :  { %p3021_p3 = pnand %p3020_p2, %p3014_p13 }
  0x43   :  { %3024 = shalt.err (!%p3021_p3)
}
  0x44   :  { %s3063_s2 = smov 64   ;;  %s3064_s14 = smov 4  }
  0x45   :  { %62 = dma.hbm_to_vmem [thread:$0]  %s3209_s4, 2048, %s57_s12, [#allocation10], %s3063_s2, %s3063_s2, %s3064_s14  }
  0x46   :  { %3047 = dma.done.wait [#allocation4], 768  }
  0x47   :  { %3048 = vsyncadd [#allocation4], 4294966528 }
  0x48   :  { %3049 = dma.done.wait [#allocation7], 32768  }
  0x49   :  { %3050 = vsyncadd [#allocation7], 4294934528 }
  0x4a   :  { %3051 = dma.done.wait [#allocation10], 2048  }
  0x4b   :  { %3052 = vsyncadd [#allocation10], 4294965248  ;;  %v2535_v0 = vld [vmem:[#allocation6 + $0x4] ss:$16 sps:$4 sm:$0xff]   ;;  %v2539_v2 = vld [vmem:[#allocation6] ss:$16 sps:$4 sm:$0xff]  }
  0x4c   :  { %v2537_v1 = vld [vmem:[#allocation6 + $0x204] ss:$16 sps:$4 sm:$0xff]   ;;  %1254 = vmatprep.subr.bf16.mxu1 %v2535_v0  ;;  %v2540_v3 = vld [vmem:[#allocation6 + $0x200] ss:$16 sps:$4 sm:$0xff]   ;;  %v91_v46 = vld [vmem:[#allocation3 + $0x8] sm:$0xff] }
  0x4d   :  { %1295 = vmatprep.subr.bf16.mxu0 %v2537_v1  ;;  %v2541_v4 = vld [vmem:[#allocation6 + $0x24] ss:$16 sps:$4 sm:$0xff]   ;;  %1255 = vmatpush1.bf16.msra.mxu1 %v2539_v2  ;;  %v2545_v6 = vld [vmem:[#allocation6 + $0x20] ss:$16 sps:$4 sm:$0xff]   ;;  %v3149_v48 = vpack.c.bf16 %v91_v46, %v91_v46  ;;  %v93_v49 = vld [vmem:[#allocation3 + $0x18] sm:$0xff] }
  0x4e   :  { %1296 = vmatpush1.bf16.msra.mxu0 %v2540_v3  ;;  %v2543_v5 = vld [vmem:[#allocation6 + $0x224] ss:$16 sps:$4 sm:$0xff]   ;;  %1256 = vmatprep.subr.bf16.mxu1 %v2541_v4  ;;  %v2546_v7 = vld [vmem:[#allocation6 + $0x220] ss:$16 sps:$4 sm:$0xff]   ;;  %v3151_v52 = vpack.c.bf16 %v93_v49, %v93_v49  ;;  %v2688_v49 = vld [vmem:[#allocation6 + $0x128] ss:$16 sps:$4 sm:$0xff]  }
  0x4f   :  { %1297 = vmatprep.subr.bf16.mxu0 %v2543_v5  ;;  %v2547_v8 = vld [vmem:[#allocation6 + $0x44] ss:$16 sps:$4 sm:$0xff]   ;;  %v2551_v10 = vld [vmem:[#allocation6 + $0x40] ss:$16 sps:$4 sm:$0xff]   ;;  %1286 = vmatprep.mubr.bf16.mxu1 %v3149_v48 }
  0x50   :  { %v2549_v9 = vld [vmem:[#allocation6 + $0x244] ss:$16 sps:$4 sm:$0xff]   ;;  %v2552_v11 = vld [vmem:[#allocation6 + $0x240] ss:$16 sps:$4 sm:$0xff]   ;;  %1327 = vmatprep.mubr.bf16.mxu0 %v3151_v52 }
  0x51   :  { %1257 = vmatpush1.bf16.msra.mxu1 %v2545_v6  ;;  %v2553_v12 = vld [vmem:[#allocation6 + $0x64] ss:$16 sps:$4 sm:$0xff]   ;;  %v2557_v14 = vld [vmem:[#allocation6 + $0x60] ss:$16 sps:$4 sm:$0xff]  }
  0x52   :  { %1298 = vmatpush1.bf16.msra.mxu0 %v2546_v7  ;;  %1258 = vmatprep.subr.bf16.mxu1 %v2547_v8  ;;  %v2555_v13 = vld [vmem:[#allocation6 + $0x264] ss:$16 sps:$4 sm:$0xff]   ;;  %v2558_v15 = vld [vmem:[#allocation6 + $0x260] ss:$16 sps:$4 sm:$0xff]   ;;  %v2636_v7 = vld [vmem:[#allocation6 + $0xc] ss:$16 sps:$4 sm:$0xff]  }
  0x53   :  { %1299 = vmatprep.subr.bf16.mxu0 %v2549_v9  ;;  %v2559_v16 = vld [vmem:[#allocation6 + $0x84] ss:$16 sps:$4 sm:$0xff]   ;;  %v2563_v18 = vld [vmem:[#allocation6 + $0x80] ss:$16 sps:$4 sm:$0xff]  }
  0x54   :  { %v2561_v17 = vld [vmem:[#allocation6 + $0x284] ss:$16 sps:$4 sm:$0xff]   ;;  %v2564_v19 = vld [vmem:[#allocation6 + $0x280] ss:$16 sps:$4 sm:$0xff]  }
  0x55   :  { %1259 = vmatpush1.bf16.msra.mxu1 %v2551_v10  ;;  %v2565_v20 = vld [vmem:[#allocation6 + $0xa4] ss:$16 sps:$4 sm:$0xff]   ;;  %v2569_v22 = vld [vmem:[#allocation6 + $0xa0] ss:$16 sps:$4 sm:$0xff]   ;;  %v2634_v10 = vld [vmem:[#allocation6 + $0x8] ss:$16 sps:$4 sm:$0xff]  }
  0x56   :  { %1300 = vmatpush1.bf16.msra.mxu0 %v2552_v11  ;;  %1260 = vmatprep.subr.bf16.mxu1 %v2553_v12  ;;  %v2567_v21 = vld [vmem:[#allocation6 + $0x2a4] ss:$16 sps:$4 sm:$0xff]   ;;  %v2570_v23 = vld [vmem:[#allocation6 + $0x2a0] ss:$16 sps:$4 sm:$0xff]  }
  0x57   :  { %1301 = vmatprep.subr.bf16.mxu0 %v2555_v13  ;;  %v2571_v24 = vld [vmem:[#allocation6 + $0xc4] ss:$16 sps:$4 sm:$0xff]   ;;  %v2575_v26 = vld [vmem:[#allocation6 + $0xc0] ss:$16 sps:$4 sm:$0xff]   ;;  %v2642_v13 = vld [vmem:[#allocation6 + $0x2c] ss:$16 sps:$4 sm:$0xff]  }
  0x58   :  { %v2573_v25 = vld [vmem:[#allocation6 + $0x2c4] ss:$16 sps:$4 sm:$0xff]   ;;  %v2576_v27 = vld [vmem:[#allocation6 + $0x2c0] ss:$16 sps:$4 sm:$0xff]  }
  0x59   :  { %1261 = vmatpush1.bf16.msra.mxu1 %v2557_v14  ;;  %v2577_v28 = vld [vmem:[#allocation6 + $0xe4] ss:$16 sps:$4 sm:$0xff]   ;;  %v2581_v30 = vld [vmem:[#allocation6 + $0xe0] ss:$16 sps:$4 sm:$0xff]  }
  0x5a   :  { %1302 = vmatpush1.bf16.msra.mxu0 %v2558_v15  ;;  %1262 = vmatprep.subr.bf16.mxu1 %v2559_v16  ;;  %v2579_v29 = vld [vmem:[#allocation6 + $0x2e4] ss:$16 sps:$4 sm:$0xff]   ;;  %v2582_v31 = vld [vmem:[#allocation6 + $0x2e0] ss:$16 sps:$4 sm:$0xff]   ;;  %v2640_v15 = vld [vmem:[#allocation6 + $0x28] ss:$16 sps:$4 sm:$0xff]  }
  0x5b   :  { %1303 = vmatprep.subr.bf16.mxu0 %v2561_v17  ;;  %v2583_v32 = vld [vmem:[#allocation6 + $0x104] ss:$16 sps:$4 sm:$0xff]   ;;  %v2587_v34 = vld [vmem:[#allocation6 + $0x100] ss:$16 sps:$4 sm:$0xff]   ;;  %v2648_v17 = vld [vmem:[#allocation6 + $0x4c] ss:$16 sps:$4 sm:$0xff]  }
  0x5c   :  { %v2585_v33 = vld [vmem:[#allocation6 + $0x304] ss:$16 sps:$4 sm:$0xff]   ;;  %v2588_v35 = vld [vmem:[#allocation6 + $0x300] ss:$16 sps:$4 sm:$0xff]  }
  0x5d   :  { %1263 = vmatpush1.bf16.msra.mxu1 %v2563_v18  ;;  %v2589_v36 = vld [vmem:[#allocation6 + $0x124] ss:$16 sps:$4 sm:$0xff]   ;;  %v2593_v38 = vld [vmem:[#allocation6 + $0x120] ss:$16 sps:$4 sm:$0xff]  }
  0x5e   :  { %1304 = vmatpush1.bf16.msra.mxu0 %v2564_v19  ;;  %1264 = vmatprep.subr.bf16.mxu1 %v2565_v20  ;;  %v2591_v37 = vld [vmem:[#allocation6 + $0x324] ss:$16 sps:$4 sm:$0xff]   ;;  %v2594_v39 = vld [vmem:[#allocation6 + $0x320] ss:$16 sps:$4 sm:$0xff]   ;;  %v2646_v19 = vld [vmem:[#allocation6 + $0x48] ss:$16 sps:$4 sm:$0xff]  }
  0x5f   :  { %1305 = vmatprep.subr.bf16.mxu0 %v2567_v21  ;;  %v2595_v40 = vld [vmem:[#allocation6 + $0x144] ss:$16 sps:$4 sm:$0xff]   ;;  %v2599_v42 = vld [vmem:[#allocation6 + $0x140] ss:$16 sps:$4 sm:$0xff]   ;;  %v2654_v21 = vld [vmem:[#allocation6 + $0x6c] ss:$16 sps:$4 sm:$0xff]  }
  0x60   :  { %v2597_v41 = vld [vmem:[#allocation6 + $0x344] ss:$16 sps:$4 sm:$0xff]   ;;  %v2600_v43 = vld [vmem:[#allocation6 + $0x340] ss:$16 sps:$4 sm:$0xff]  }
  0x61   :  { %1265 = vmatpush1.bf16.msra.mxu1 %v2569_v22  ;;  %v2601_v44 = vld [vmem:[#allocation6 + $0x164] ss:$16 sps:$4 sm:$0xff]   ;;  %v2605_v47 = vld [vmem:[#allocation6 + $0x160] ss:$16 sps:$4 sm:$0xff]  }
  0x62   :  { %1306 = vmatpush1.bf16.msra.mxu0 %v2570_v23  ;;  %1266 = vmatprep.subr.bf16.mxu1 %v2571_v24  ;;  %v2603_v45 = vld [vmem:[#allocation6 + $0x364] ss:$16 sps:$4 sm:$0xff]   ;;  %v2606_v50 = vld [vmem:[#allocation6 + $0x360] ss:$16 sps:$4 sm:$0xff]   ;;  %v2652_v23 = vld [vmem:[#allocation6 + $0x68] ss:$16 sps:$4 sm:$0xff]  }
  0x63   :  { %1307 = vmatprep.subr.bf16.mxu0 %v2573_v25  ;;  %v2607_v51 = vld [vmem:[#allocation6 + $0x184] ss:$16 sps:$4 sm:$0xff]   ;;  %v2611_v54 = vld [vmem:[#allocation6 + $0x180] ss:$16 sps:$4 sm:$0xff]   ;;  %v2660_v25 = vld [vmem:[#allocation6 + $0x8c] ss:$16 sps:$4 sm:$0xff]  }
  0x64   :  { %v2609_v53 = vld [vmem:[#allocation6 + $0x384] ss:$16 sps:$4 sm:$0xff]   ;;  %v2612_v55 = vld [vmem:[#allocation6 + $0x380] ss:$16 sps:$4 sm:$0xff]  }
  0x65   :  { %1267 = vmatpush1.bf16.msra.mxu1 %v2575_v26  ;;  %v2613_v56 = vld [vmem:[#allocation6 + $0x1a4] ss:$16 sps:$4 sm:$0xff]   ;;  %v2617_v58 = vld [vmem:[#allocation6 + $0x1a0] ss:$16 sps:$4 sm:$0xff]  }
  0x66   :  { %1308 = vmatpush1.bf16.msra.mxu0 %v2576_v27  ;;  %1268 = vmatprep.subr.bf16.mxu1 %v2577_v28  ;;  %v2615_v57 = vld [vmem:[#allocation6 + $0x3a4] ss:$16 sps:$4 sm:$0xff]   ;;  %v2618_v59 = vld [vmem:[#allocation6 + $0x3a0] ss:$16 sps:$4 sm:$0xff]   ;;  %v2658_v27 = vld [vmem:[#allocation6 + $0x88] ss:$16 sps:$4 sm:$0xff]  }
  0x67   :  { %1309 = vmatprep.subr.bf16.mxu0 %v2579_v29  ;;  %v2619_v60 = vld [vmem:[#allocation6 + $0x1c4] ss:$16 sps:$4 sm:$0xff]   ;;  %v2623_v62 = vld [vmem:[#allocation6 + $0x1c0] ss:$16 sps:$4 sm:$0xff]   ;;  %v2666_v29 = vld [vmem:[#allocation6 + $0xac] ss:$16 sps:$4 sm:$0xff]  }
  0x68   :  { %v2621_v61 = vld [vmem:[#allocation6 + $0x3c4] ss:$16 sps:$4 sm:$0xff]   ;;  %v2624_v63 = vld [vmem:[#allocation6 + $0x3c0] ss:$16 sps:$4 sm:$0xff]  }
  0x69   :  { %1269 = vmatpush1.bf16.msra.mxu1 %v2581_v30  ;;  %v2625_v0 = vld [vmem:[#allocation6 + $0x1e4] ss:$16 sps:$4 sm:$0xff]   ;;  %v2629_v2 = vld [vmem:[#allocation6 + $0x1e0] ss:$16 sps:$4 sm:$0xff]  }
  0x6a   :  { %1310 = vmatpush1.bf16.msra.mxu0 %v2582_v31  ;;  %1270 = vmatprep.subr.bf16.mxu1 %v2583_v32  ;;  %v2627_v1 = vld [vmem:[#allocation6 + $0x3e4] ss:$16 sps:$4 sm:$0xff]   ;;  %v2630_v3 = vld [vmem:[#allocation6 + $0x3e0] ss:$16 sps:$4 sm:$0xff]   ;;  %v2664_v31 = vld [vmem:[#allocation6 + $0xa8] ss:$16 sps:$4 sm:$0xff]  }
  0x6b   :  { %1311 = vmatprep.subr.bf16.mxu0 %v2585_v33  ;;  %v90_v4 = vld [vmem:[#allocation3] sm:$0xff]  ;;  %v92_v6 = vld [vmem:[#allocation3 + $0x10] sm:$0xff]  ;;  %v2672_v33 = vld [vmem:[#allocation6 + $0xcc] ss:$16 sps:$4 sm:$0xff]  }
  0x6c   :  { %v2633_v5 = vld [vmem:[#allocation6 + $0x404] ss:$16 sps:$4 sm:$0xff]   ;;  %v3155_v8 = vpack.c.bf16 %v90_v4, %v90_v4  ;;  %v2631_v9 = vld [vmem:[#allocation6 + $0x400] ss:$16 sps:$4 sm:$0xff]   ;;  %v3157_v11 = vpack.c.bf16 %v92_v6, %v92_v6  ;;  %v2720_v4 = vld [vmem:[#allocation6 + $0x1cc] ss:$16 sps:$4 sm:$0xff]  }
  0x6d   :  { %1271 = vmatpush1.bf16.msra.mxu1 %v2587_v34  ;;  %v2639_v12 = vld [vmem:[#allocation6 + $0x424] ss:$16 sps:$4 sm:$0xff]   ;;  %v2637_v14 = vld [vmem:[#allocation6 + $0x420] ss:$16 sps:$4 sm:$0xff]   ;;  %v95_v34 = vld [vmem:[#allocation3 + $0x28] sm:$0xff] }
  0x6e   :  { %1312 = vmatpush1.bf16.msra.mxu0 %v2588_v35  ;;  %1272 = vmatprep.subr.bf16.mxu1 %v2589_v36  ;;  %v2645_v16 = vld [vmem:[#allocation6 + $0x444] ss:$16 sps:$4 sm:$0xff]   ;;  %v2643_v18 = vld [vmem:[#allocation6 + $0x440] ss:$16 sps:$4 sm:$0xff]   ;;  %v3162_v35 = vpack.c.bf16 %v95_v34, %v95_v34  ;;  %v2718_v6 = vld [vmem:[#allocation6 + $0x1c8] ss:$16 sps:$4 sm:$0xff]  }
  0x6f   :  { %1313 = vmatprep.subr.bf16.mxu0 %v2591_v37  ;;  %v2651_v20 = vld [vmem:[#allocation6 + $0x464] ss:$16 sps:$4 sm:$0xff]   ;;  %v2649_v22 = vld [vmem:[#allocation6 + $0x460] ss:$16 sps:$4 sm:$0xff]   ;;  %v2670_v37 = vld [vmem:[#allocation6 + $0xc8] ss:$16 sps:$4 sm:$0xff]  }
  0x70   :  { %v2657_v24 = vld [vmem:[#allocation6 + $0x484] ss:$16 sps:$4 sm:$0xff]   ;;  %v2655_v26 = vld [vmem:[#allocation6 + $0x480] ss:$16 sps:$4 sm:$0xff]   ;;  %v2757_v34 = vld [vmem:[#allocation6 + $0x348] ss:$16 sps:$4 sm:$0xff]  }
  0x71   :  { %1273 = vmatpush1.bf16.msra.mxu1 %v2593_v38  ;;  %v2663_v28 = vld [vmem:[#allocation6 + $0x4a4] ss:$16 sps:$4 sm:$0xff]   ;;  %v2661_v30 = vld [vmem:[#allocation6 + $0x4a0] ss:$16 sps:$4 sm:$0xff]  }
  0x72   :  { %1314 = vmatpush1.bf16.msra.mxu0 %v2594_v39  ;;  %1274 = vmatprep.subr.bf16.mxu1 %v2595_v40  ;;  %v2669_v32 = vld [vmem:[#allocation6 + $0x4c4] ss:$16 sps:$4 sm:$0xff]   ;;  %v2667_v36 = vld [vmem:[#allocation6 + $0x4c0] ss:$16 sps:$4 sm:$0xff]   ;;  %v2678_v39 = vld [vmem:[#allocation6 + $0xec] ss:$16 sps:$4 sm:$0xff]  }
  0x73   :  { %1315 = vmatprep.subr.bf16.mxu0 %v2597_v41  ;;  %v2675_v38 = vld [vmem:[#allocation6 + $0x4e4] ss:$16 sps:$4 sm:$0xff]   ;;  %v2673_v40 = vld [vmem:[#allocation6 + $0x4e0] ss:$16 sps:$4 sm:$0xff]   ;;  %v2676_v41 = vld [vmem:[#allocation6 + $0xe8] ss:$16 sps:$4 sm:$0xff]  }
  0x74   :  { %v2687_v46 = vld [vmem:[#allocation6 + $0x524] ss:$16 sps:$4 sm:$0xff]  }
  0x75   :  { %1275 = vmatpush1.bf16.msra.mxu1 %v2599_v42  ;;  %v2681_v42 = vld [vmem:[#allocation6 + $0x504] ss:$16 sps:$4 sm:$0xff]  }
  0x76   :  { %1316 = vmatpush1.bf16.msra.mxu0 %v2600_v43  ;;  %1276 = vmatprep.subr.bf16.mxu1 %v2601_v44  ;;  %v2684_v43 = vld [vmem:[#allocation6 + $0x10c] ss:$16 sps:$4 sm:$0xff]   ;;  %v2679_v44 = vld [vmem:[#allocation6 + $0x500] ss:$16 sps:$4 sm:$0xff]  }
  0x77   :  { %1317 = vmatprep.subr.bf16.mxu0 %v2603_v45  ;;  %v2682_v45 = vld [vmem:[#allocation6 + $0x108] ss:$16 sps:$4 sm:$0xff]  }
  0x79   :  { %1277 = vmatpush1.bf16.msra.mxu1 %v2605_v47  ;;  %v2690_v47 = vld [vmem:[#allocation6 + $0x12c] ss:$16 sps:$4 sm:$0xff]  }
  0x7a   :  { %1318 = vmatpush1.bf16.msra.mxu0 %v2606_v50  ;;  %1278 = vmatprep.subr.bf16.mxu1 %v2607_v51  ;;  %v2693_v50 = vld [vmem:[#allocation6 + $0x544] ss:$16 sps:$4 sm:$0xff]   ;;  %v2696_v51 = vld [vmem:[#allocation6 + $0x14c] ss:$16 sps:$4 sm:$0xff]  }
  0x7b   :  { %1319 = vmatprep.subr.bf16.mxu0 %v2609_v53  ;;  %v2691_v53 = vld [vmem:[#allocation6 + $0x540] ss:$16 sps:$4 sm:$0xff]  }
  0x7d   :  { %1279 = vmatpush1.bf16.msra.mxu1 %v2611_v54  ;;  %v2694_v54 = vld [vmem:[#allocation6 + $0x148] ss:$16 sps:$4 sm:$0xff]  }
  0x7e   :  { %1320 = vmatpush1.bf16.msra.mxu0 %v2612_v55  ;;  %1280 = vmatprep.subr.bf16.mxu1 %v2613_v56  ;;  %v2699_v55 = vld [vmem:[#allocation6 + $0x564] ss:$16 sps:$4 sm:$0xff]   ;;  %v2702_v56 = vld [vmem:[#allocation6 + $0x16c] ss:$16 sps:$4 sm:$0xff]  }
  0x7f   :  { %1321 = vmatprep.subr.bf16.mxu0 %v2615_v57  ;;  %v2697_v57 = vld [vmem:[#allocation6 + $0x560] ss:$16 sps:$4 sm:$0xff]  }
  0x81   :  { %1281 = vmatpush1.bf16.msra.mxu1 %v2617_v58  ;;  %v2700_v58 = vld [vmem:[#allocation6 + $0x168] ss:$16 sps:$4 sm:$0xff]  }
  0x82   :  { %1322 = vmatpush1.bf16.msra.mxu0 %v2618_v59  ;;  %1282 = vmatprep.subr.bf16.mxu1 %v2619_v60  ;;  %v2705_v59 = vld [vmem:[#allocation6 + $0x584] ss:$16 sps:$4 sm:$0xff]   ;;  %v2708_v60 = vld [vmem:[#allocation6 + $0x18c] ss:$16 sps:$4 sm:$0xff]  }
  0x83   :  { %1323 = vmatprep.subr.bf16.mxu0 %v2621_v61  ;;  %v2703_v61 = vld [vmem:[#allocation6 + $0x580] ss:$16 sps:$4 sm:$0xff]  }
  0x85   :  { %1283 = vmatpush1.bf16.msra.mxu1 %v2623_v62  ;;  %v2706_v62 = vld [vmem:[#allocation6 + $0x188] ss:$16 sps:$4 sm:$0xff]  }
  0x86   :  { %1324 = vmatpush1.bf16.msra.mxu0 %v2624_v63  ;;  %1284 = vmatprep.subr.bf16.mxu1 %v2625_v0  ;;  %v2711_v63 = vld [vmem:[#allocation6 + $0x5a4] ss:$16 sps:$4 sm:$0xff]   ;;  %v2714_v0 = vld [vmem:[#allocation6 + $0x1ac] ss:$16 sps:$4 sm:$0xff]  }
  0x87   :  { %1325 = vmatprep.subr.bf16.mxu0 %v2627_v1  ;;  %v2709_v1 = vld [vmem:[#allocation6 + $0x5a0] ss:$16 sps:$4 sm:$0xff]  }
  0x89   :  { %1285 = vmatpush1.bf16.msra.mxu1 %v2629_v2  ;;  %v2712_v2 = vld [vmem:[#allocation6 + $0x1a8] ss:$16 sps:$4 sm:$0xff]  }
  0x8a   :  { %1326 = vmatpush1.bf16.msra.mxu0 %v2630_v3  ;;  %1377 = vmatprep.subr.bf16.mxu1 %v2636_v7  ;;  %v2717_v3 = vld [vmem:[#allocation6 + $0x5c4] ss:$16 sps:$4 sm:$0xff]  }
  0x8b   :  { %1336 = vmatprep.subr.bf16.mxu0 %v2633_v5  ;;  %v2715_v5 = vld [vmem:[#allocation6 + $0x5c0] ss:$16 sps:$4 sm:$0xff]   ;;  %v2723_v7 = vld [vmem:[#allocation6 + $0x5e4] ss:$16 sps:$4 sm:$0xff]  }
  0x8c   :  { %1287 = vmatmul.mubr.bf16.vlgmr.msra.gmra.mrb[0].mxu1 %v3155_v8 }
  0x8d   :  { %1328 = vmatmul.mubr.bf16.vlgmr.msra.gmra.mrb[0].mxu0 %v3157_v11  ;;  %1378 = vmatpush1.bf16.msra.mxu1 %v2634_v10  ;;  %v2721_v10 = vld [vmem:[#allocation6 + $0x5e0] ss:$16 sps:$4 sm:$0xff]  }
  0x8e   :  { %1337 = vmatpush1.bf16.msra.mxu0 %v2631_v9  ;;  %1379 = vmatprep.subr.bf16.mxu1 %v2642_v13  ;;  %v2726_v9 = vld [vmem:[#allocation6 + $0x1ec] ss:$16 sps:$4 sm:$0xff]   ;;  %v94_v13 = vld [vmem:[#allocation3 + $0x20] sm:$0xff] }
  0x8f   :  { %1338 = vmatprep.subr.bf16.mxu0 %v2639_v12  ;;  %1409 = vmatprep.mubr.bf16.mxu1 %v3149_v48  ;;  %v2685_v48 = vld [vmem:[#allocation6 + $0x520] ss:$16 sps:$4 sm:$0xff]   ;;  %v2724_v12 = vld [vmem:[#allocation6 + $0x1e8] ss:$16 sps:$4 sm:$0xff]  }
  0x90   :  { %1368 = vmatprep.mubr.bf16.mxu0 %v3162_v35 }
  0x91   :  { %1380 = vmatpush1.bf16.msra.mxu1 %v2640_v15  ;;  %v3165_v15 = vpack.c.bf16 %v94_v13, %v94_v13  ;;  %v2822_v13 = vld [vmem:[#allocation6 + $0x5ec] ss:$16 sps:$4 sm:$0xff]  }
  0x92   :  { %1339 = vmatpush1.bf16.msra.mxu0 %v2637_v14  ;;  %1381 = vmatprep.subr.bf16.mxu1 %v2648_v17  ;;  %v2729_v14 = vld [vmem:[#allocation6 + $0x20c] ss:$16 sps:$4 sm:$0xff]  }
  0x93   :  { %1340 = vmatprep.subr.bf16.mxu0 %v2645_v16  ;;  %v2727_v16 = vld [vmem:[#allocation6 + $0x208] ss:$16 sps:$4 sm:$0xff]   ;;  %v2732_v17 = vld [vmem:[#allocation6 + $0x22c] ss:$16 sps:$4 sm:$0xff]  }
  0x95   :  { %1382 = vmatpush1.bf16.msra.mxu1 %v2646_v19  ;;  %v2735_v19 = vld [vmem:[#allocation6 + $0x24c] ss:$16 sps:$4 sm:$0xff]  }
  0x96   :  { %1341 = vmatpush1.bf16.msra.mxu0 %v2643_v18  ;;  %1383 = vmatprep.subr.bf16.mxu1 %v2654_v21  ;;  %v2730_v18 = vld [vmem:[#allocation6 + $0x228] ss:$16 sps:$4 sm:$0xff]   ;;  %v2738_v21 = vld [vmem:[#allocation6 + $0x26c] ss:$16 sps:$4 sm:$0xff]  }
  0x97   :  { %1342 = vmatprep.subr.bf16.mxu0 %v2651_v20  ;;  %v2733_v20 = vld [vmem:[#allocation6 + $0x248] ss:$16 sps:$4 sm:$0xff]  }
  0x99   :  { %1384 = vmatpush1.bf16.msra.mxu1 %v2652_v23  ;;  %v2741_v23 = vld [vmem:[#allocation6 + $0x28c] ss:$16 sps:$4 sm:$0xff]  }
  0x9a   :  { %1343 = vmatpush1.bf16.msra.mxu0 %v2649_v22  ;;  %1385 = vmatprep.subr.bf16.mxu1 %v2660_v25  ;;  %v2736_v22 = vld [vmem:[#allocation6 + $0x268] ss:$16 sps:$4 sm:$0xff]   ;;  %v2744_v25 = vld [vmem:[#allocation6 + $0x2ac] ss:$16 sps:$4 sm:$0xff]  }
  0x9b   :  { %1344 = vmatprep.subr.bf16.mxu0 %v2657_v24  ;;  %v2739_v24 = vld [vmem:[#allocation6 + $0x288] ss:$16 sps:$4 sm:$0xff]  }
  0x9d   :  { %1386 = vmatpush1.bf16.msra.mxu1 %v2658_v27  ;;  %v2747_v27 = vld [vmem:[#allocation6 + $0x2cc] ss:$16 sps:$4 sm:$0xff]  }
  0x9e   :  { %1345 = vmatpush1.bf16.msra.mxu0 %v2655_v26  ;;  %1387 = vmatprep.subr.bf16.mxu1 %v2666_v29  ;;  %v2742_v26 = vld [vmem:[#allocation6 + $0x2a8] ss:$16 sps:$4 sm:$0xff]   ;;  %v2753_v29 = vld [vmem:[#allocation6 + $0x30c] ss:$16 sps:$4 sm:$0xff]  }
  0x9f   :  { %1346 = vmatprep.subr.bf16.mxu0 %v2663_v28  ;;  %v2750_v28 = vld [vmem:[#allocation6 + $0x2ec] ss:$16 sps:$4 sm:$0xff]  }
  0xa1   :  { %1388 = vmatpush1.bf16.msra.mxu1 %v2664_v31  ;;  %v2756_v31 = vld [vmem:[#allocation6 + $0x32c] ss:$16 sps:$4 sm:$0xff]  }
  0xa2   :  { %1347 = vmatpush1.bf16.msra.mxu0 %v2661_v30  ;;  %1389 = vmatprep.subr.bf16.mxu1 %v2672_v33  ;;  %v2751_v30 = vld [vmem:[#allocation6 + $0x308] ss:$16 sps:$4 sm:$0xff]   ;;  %v2759_v33 = vld [vmem:[#allocation6 + $0x34c] ss:$16 sps:$4 sm:$0xff]  }
  0xa3   :  { %1348 = vmatprep.subr.bf16.mxu0 %v2669_v32  ;;  %v2754_v32 = vld [vmem:[#allocation6 + $0x328] ss:$16 sps:$4 sm:$0xff]  }
  0xa5   :  { %1390 = vmatpush1.bf16.msra.mxu1 %v2670_v37  ;;  %v2760_v37 = vld [vmem:[#allocation6 + $0x368] ss:$16 sps:$4 sm:$0xff]  }
  0xa6   :  { %1349 = vmatpush1.bf16.msra.mxu0 %v2667_v36  ;;  %1391 = vmatprep.subr.bf16.mxu1 %v2678_v39  ;;  %v2762_v36 = vld [vmem:[#allocation6 + $0x36c] ss:$16 sps:$4 sm:$0xff]   ;;  %v2763_v39 = vld [vmem:[#allocation6 + $0x388] ss:$16 sps:$4 sm:$0xff]  }
  0xa7   :  { %1350 = vmatprep.subr.bf16.mxu0 %v2675_v38  ;;  %v2765_v38 = vld [vmem:[#allocation6 + $0x38c] ss:$16 sps:$4 sm:$0xff]  }
  0xa9   :  { %1392 = vmatpush1.bf16.msra.mxu1 %v2676_v41  ;;  %v2766_v41 = vld [vmem:[#allocation6 + $0x3a8] ss:$16 sps:$4 sm:$0xff]  }
  0xaa   :  { %1351 = vmatpush1.bf16.msra.mxu0 %v2673_v40  ;;  %1393 = vmatprep.subr.bf16.mxu1 %v2684_v43  ;;  %v2768_v40 = vld [vmem:[#allocation6 + $0x3ac] ss:$16 sps:$4 sm:$0xff]   ;;  %v2769_v43 = vld [vmem:[#allocation6 + $0x3c8] ss:$16 sps:$4 sm:$0xff]  }
  0xab   :  { %1352 = vmatprep.subr.bf16.mxu0 %v2681_v42  ;;  %v2771_v42 = vld [vmem:[#allocation6 + $0x3cc] ss:$16 sps:$4 sm:$0xff]  }
  0xad   :  { %1394 = vmatpush1.bf16.msra.mxu1 %v2682_v45  ;;  %v2772_v45 = vld [vmem:[#allocation6 + $0x3e8] ss:$16 sps:$4 sm:$0xff]  }
  0xae   :  { %1353 = vmatpush1.bf16.msra.mxu0 %v2679_v44  ;;  %1395 = vmatprep.subr.bf16.mxu1 %v2690_v47  ;;  %v2774_v44 = vld [vmem:[#allocation6 + $0x3ec] ss:$16 sps:$4 sm:$0xff]   ;;  %v2775_v47 = vld [vmem:[#allocation6 + $0x408] ss:$16 sps:$4 sm:$0xff]  }
  0xaf   :  { %1354 = vmatprep.subr.bf16.mxu0 %v2687_v46  ;;  %v2777_v46 = vld [vmem:[#allocation6 + $0x40c] ss:$16 sps:$4 sm:$0xff]  }
  0xb1   :  { %1396 = vmatpush1.bf16.msra.mxu1 %v2688_v49  ;;  %v2778_v49 = vld [vmem:[#allocation6 + $0x428] ss:$16 sps:$4 sm:$0xff]  }
  0xb2   :  { %1355 = vmatpush1.bf16.msra.mxu0 %v2685_v48  ;;  %1397 = vmatprep.subr.bf16.mxu1 %v2696_v51  ;;  %v2780_v48 = vld [vmem:[#allocation6 + $0x42c] ss:$16 sps:$4 sm:$0xff]   ;;  %v2781_v51 = vld [vmem:[#allocation6 + $0x448] ss:$16 sps:$4 sm:$0xff]  }
  0xb3   :  { %1356 = vmatprep.subr.bf16.mxu0 %v2693_v50  ;;  %v2783_v50 = vld [vmem:[#allocation6 + $0x44c] ss:$16 sps:$4 sm:$0xff]  }
  0xb5   :  { %1398 = vmatpush1.bf16.msra.mxu1 %v2694_v54  ;;  %v2784_v54 = vld [vmem:[#allocation6 + $0x468] ss:$16 sps:$4 sm:$0xff]  }
  0xb6   :  { %1357 = vmatpush1.bf16.msra.mxu0 %v2691_v53  ;;  %1399 = vmatprep.subr.bf16.mxu1 %v2702_v56  ;;  %v2786_v53 = vld [vmem:[#allocation6 + $0x46c] ss:$16 sps:$4 sm:$0xff]   ;;  %v2787_v56 = vld [vmem:[#allocation6 + $0x488] ss:$16 sps:$4 sm:$0xff]  }
  0xb7   :  { %1358 = vmatprep.subr.bf16.mxu0 %v2699_v55  ;;  %v2789_v55 = vld [vmem:[#allocation6 + $0x48c] ss:$16 sps:$4 sm:$0xff]  }
  0xb9   :  { %1400 = vmatpush1.bf16.msra.mxu1 %v2700_v58  ;;  %v2795_v58 = vld [vmem:[#allocation6 + $0x4cc] ss:$16 sps:$4 sm:$0xff]  }
  0xba   :  { %1359 = vmatpush1.bf16.msra.mxu0 %v2697_v57  ;;  %1401 = vmatprep.subr.bf16.mxu1 %v2708_v60  ;;  %v2792_v57 = vld [vmem:[#allocation6 + $0x4ac] ss:$16 sps:$4 sm:$0xff]   ;;  %v2796_v60 = vld [vmem:[#allocation6 + $0x4e8] ss:$16 sps:$4 sm:$0xff]  }
  0xbb   :  { %1360 = vmatprep.subr.bf16.mxu0 %v2705_v59  ;;  %v2798_v59 = vld [vmem:[#allocation6 + $0x4ec] ss:$16 sps:$4 sm:$0xff]  }
  0xbd   :  { %1402 = vmatpush1.bf16.msra.mxu1 %v2706_v62  ;;  %v2799_v62 = vld [vmem:[#allocation6 + $0x508] ss:$16 sps:$4 sm:$0xff]  }
  0xbe   :  { %1361 = vmatpush1.bf16.msra.mxu0 %v2703_v61  ;;  %1403 = vmatprep.subr.bf16.mxu1 %v2714_v0  ;;  %v2801_v61 = vld [vmem:[#allocation6 + $0x50c] ss:$16 sps:$4 sm:$0xff]   ;;  %v2802_v0 = vld [vmem:[#allocation6 + $0x528] ss:$16 sps:$4 sm:$0xff]  }
  0xbf   :  { %1362 = vmatprep.subr.bf16.mxu0 %v2711_v63  ;;  %v2804_v63 = vld [vmem:[#allocation6 + $0x52c] ss:$16 sps:$4 sm:$0xff]  }
  0xc1   :  { %1404 = vmatpush1.bf16.msra.mxu1 %v2712_v2  ;;  %v2805_v2 = vld [vmem:[#allocation6 + $0x548] ss:$16 sps:$4 sm:$0xff]  }
  0xc2   :  { %1363 = vmatpush1.bf16.msra.mxu0 %v2709_v1  ;;  %1405 = vmatprep.subr.bf16.mxu1 %v2720_v4  ;;  %v2807_v1 = vld [vmem:[#allocation6 + $0x54c] ss:$16 sps:$4 sm:$0xff]   ;;  %v2808_v4 = vld [vmem:[#allocation6 + $0x568] ss:$16 sps:$4 sm:$0xff]  }
  0xc3   :  { %1364 = vmatprep.subr.bf16.mxu0 %v2717_v3  ;;  %v2810_v3 = vld [vmem:[#allocation6 + $0x56c] ss:$16 sps:$4 sm:$0xff]  }
  0xc5   :  { %1406 = vmatpush1.bf16.msra.mxu1 %v2718_v6  ;;  %v2811_v6 = vld [vmem:[#allocation6 + $0x588] ss:$16 sps:$4 sm:$0xff]  }
  0xc6   :  { %1365 = vmatpush1.bf16.msra.mxu0 %v2715_v5  ;;  %1407 = vmatprep.subr.bf16.mxu1 %v2726_v9  ;;  %v2813_v5 = vld [vmem:[#allocation6 + $0x58c] ss:$16 sps:$4 sm:$0xff]   ;;  %v2814_v9 = vld [vmem:[#allocation6 + $0x5a8] ss:$16 sps:$4 sm:$0xff]  }
  0xc7   :  { %1366 = vmatprep.subr.bf16.mxu0 %v2723_v7  ;;  %v2816_v7 = vld [vmem:[#allocation6 + $0x5ac] ss:$16 sps:$4 sm:$0xff]  }
  0xc9   :  { %1408 = vmatpush1.bf16.msra.mxu1 %v2724_v12  ;;  %v2817_v12 = vld [vmem:[#allocation6 + $0x5c8] ss:$16 sps:$4 sm:$0xff]  }
  0xca   :  { %1367 = vmatpush1.bf16.msra.mxu0 %v2721_v10  ;;  %1418 = vmatprep.subr.bf16.mxu1 %v2729_v14  ;;  %v2819_v10 = vld [vmem:[#allocation6 + $0x5cc] ss:$16 sps:$4 sm:$0xff]   ;;  %v2820_v14 = vld [vmem:[#allocation6 + $0x5e8] ss:$16 sps:$4 sm:$0xff]  }
  0xcc   :  { %1410 = vmatmul.mubr.bf16.vlgmr.msra.gmra.mrb[4].mxu1 %v3155_v8  ;;  %v2745_v8 = vld [vmem:[#allocation6 + $0x2c8] ss:$16 sps:$4 sm:$0xff]  }
  0xcd   :  { %1369 = vmatmul.mubr.bf16.vlgmr.msra.gmra.mrb[0].mxu0 %v3165_v15  ;;  %1419 = vmatpush1.bf16.msra.mxu1 %v2727_v16 }
  0xce   :  { %1450 = vmatprep.mubr.bf16.mxu1 %v3151_v52  ;;  %1420 = vmatprep.subr.bf16.mxu1 %v2732_v17  ;;  %v2748_v52 = vld [vmem:[#allocation6 + $0x2e8] ss:$16 sps:$4 sm:$0xff]  }
  0xd1   :  { %1421 = vmatpush1.bf16.msra.mxu1 %v2730_v18 }
  0xd2   :  { %1422 = vmatprep.subr.bf16.mxu1 %v2735_v19 }
  0xd5   :  { %1423 = vmatpush1.bf16.msra.mxu1 %v2733_v20 }
  0xd6   :  { %1424 = vmatprep.subr.bf16.mxu1 %v2738_v21 }
  0xd9   :  { %1425 = vmatpush1.bf16.msra.mxu1 %v2736_v22 }
  0xda   :  { %1426 = vmatprep.subr.bf16.mxu1 %v2741_v23 }
  0xdd   :  { %1427 = vmatpush1.bf16.msra.mxu1 %v2739_v24 }
  0xde   :  { %1428 = vmatprep.subr.bf16.mxu1 %v2744_v25 }
  0xe1   :  { %1429 = vmatpush1.bf16.msra.mxu1 %v2742_v26  ;;  %v2823_v26 = vld [vmem:[#allocation8] ss:$8 sps:$4 sm:$0xff]  }
  0xe2   :  { %1430 = vmatprep.subr.bf16.mxu1 %v2747_v27  ;;  %v2825_v27 = vld [vmem:[#allocation8 + $0x4] ss:$8 sps:$4 sm:$0xff]  }
  0xe3   :  { %1930 = vmatprep.subr.bf16.mxu0 %v2825_v27 }
  0xe4   :  { %1931 = vmatpush1.bf16.msra.mxu0 %v2823_v26 }
  0xe5   :  { %1431 = vmatpush1.bf16.msra.mxu1 %v2745_v8  ;;  %v2828_v8 = vld [vmem:[#allocation8 + $0x14] ss:$8 sps:$4 sm:$0xff]  }
  0xe6   :  { %1432 = vmatprep.subr.bf16.mxu1 %v2750_v28  ;;  %v2826_v28 = vld [vmem:[#allocation8 + $0x10] ss:$8 sps:$4 sm:$0xff]   ;;  %1932 = vmatprep.subr.bf16.mxu0 %v2828_v8  ;;  %v2871_v8 = vld [vmem:[#allocation8 + $0x100] ss:$8 sps:$4 sm:$0xff]  }
  0xe8   :  { %1933 = vmatpush1.bf16.msra.mxu0 %v2826_v28 }
  0xe9   :  { %1433 = vmatpush1.bf16.msra.mxu1 %v2748_v52  ;;  %v2829_v52 = vld [vmem:[#allocation8 + $0x20] ss:$8 sps:$4 sm:$0xff]  }
  0xea   :  { %1434 = vmatprep.subr.bf16.mxu1 %v2753_v29  ;;  %v2834_v29 = vld [vmem:[#allocation8 + $0x34] ss:$8 sps:$4 sm:$0xff]  }
  0xed   :  { %1435 = vmatpush1.bf16.msra.mxu1 %v2751_v30  ;;  %v2832_v30 = vld [vmem:[#allocation8 + $0x30] ss:$8 sps:$4 sm:$0xff]  }
  0xee   :  { %1436 = vmatprep.subr.bf16.mxu1 %v2756_v31  ;;  %v2837_v31 = vld [vmem:[#allocation8 + $0x44] ss:$8 sps:$4 sm:$0xff]  }
  0xf1   :  { %1437 = vmatpush1.bf16.msra.mxu1 %v2754_v32  ;;  %v2835_v32 = vld [vmem:[#allocation8 + $0x40] ss:$8 sps:$4 sm:$0xff]  }
  0xf2   :  { %1438 = vmatprep.subr.bf16.mxu1 %v2759_v33  ;;  %v2840_v33 = vld [vmem:[#allocation8 + $0x54] ss:$8 sps:$4 sm:$0xff]  }
  0xf5   :  { %1439 = vmatpush1.bf16.msra.mxu1 %v2757_v34  ;;  %v2838_v34 = vld [vmem:[#allocation8 + $0x50] ss:$8 sps:$4 sm:$0xff]  }
  0xf6   :  { %1440 = vmatprep.subr.bf16.mxu1 %v2762_v36  ;;  %v2843_v36 = vld [vmem:[#allocation8 + $0x64] ss:$8 sps:$4 sm:$0xff]  }
  0xf9   :  { %1441 = vmatpush1.bf16.msra.mxu1 %v2760_v37  ;;  %v2841_v37 = vld [vmem:[#allocation8 + $0x60] ss:$8 sps:$4 sm:$0xff]  }
  0xfa   :  { %1442 = vmatprep.subr.bf16.mxu1 %v2765_v38  ;;  %v2846_v38 = vld [vmem:[#allocation8 + $0x74] ss:$8 sps:$4 sm:$0xff]  }
  0xfd   :  { %1443 = vmatpush1.bf16.msra.mxu1 %v2763_v39  ;;  %v2844_v39 = vld [vmem:[#allocation8 + $0x70] ss:$8 sps:$4 sm:$0xff]  }
  0xfe   :  { %1444 = vmatprep.subr.bf16.mxu1 %v2768_v40  ;;  %v2849_v40 = vld [vmem:[#allocation8 + $0x84] ss:$8 sps:$4 sm:$0xff]  }
 0x101   :  { %1445 = vmatpush1.bf16.msra.mxu1 %v2766_v41  ;;  %v2847_v41 = vld [vmem:[#allocation8 + $0x80] ss:$8 sps:$4 sm:$0xff]  }
 0x102   :  { %1446 = vmatprep.subr.bf16.mxu1 %v2771_v42  ;;  %v2852_v42 = vld [vmem:[#allocation8 + $0x94] ss:$8 sps:$4 sm:$0xff]  }
 0x105   :  { %1447 = vmatpush1.bf16.msra.mxu1 %v2769_v43  ;;  %v2850_v43 = vld [vmem:[#allocation8 + $0x90] ss:$8 sps:$4 sm:$0xff]  }
 0x106   :  { %1448 = vmatprep.subr.bf16.mxu1 %v2774_v44  ;;  %v2855_v44 = vld [vmem:[#allocation8 + $0xa4] ss:$8 sps:$4 sm:$0xff]  }
 0x109   :  { %1449 = vmatpush1.bf16.msra.mxu1 %v2772_v45  ;;  %v2853_v45 = vld [vmem:[#allocation8 + $0xa0] ss:$8 sps:$4 sm:$0xff]  }
 0x10a   :  { %1459 = vmatprep.subr.bf16.mxu1 %v2777_v46  ;;  %v2858_v46 = vld [vmem:[#allocation8 + $0xb4] ss:$8 sps:$4 sm:$0xff]  }
 0x10c   :  { %1451 = vmatmul.mubr.bf16.vlgmr.msra.gmra.mrb[4].mxu1 %v3157_v11  ;;  %v2790_v11 = vld [vmem:[#allocation6 + $0x4a8] ss:$16 sps:$4 sm:$0xff]  }
 0x10d   :  { %1460 = vmatpush1.bf16.msra.mxu1 %v2775_v47  ;;  %1491 = vmatprep.mubr.bf16.mxu1 %v3162_v35  ;;  %v2793_v35 = vld [vmem:[#allocation6 + $0x4c8] ss:$16 sps:$4 sm:$0xff]  }
 0x10e   :  { %1461 = vmatprep.subr.bf16.mxu1 %v2780_v48  ;;  %v2856_v47 = vld [vmem:[#allocation8 + $0xb0] ss:$8 sps:$4 sm:$0xff]  }
 0x111   :  { %1462 = vmatpush1.bf16.msra.mxu1 %v2778_v49 }
 0x112   :  { %1463 = vmatprep.subr.bf16.mxu1 %v2783_v50 }
 0x115   :  { %1464 = vmatpush1.bf16.msra.mxu1 %v2781_v51 }
 0x116   :  { %1465 = vmatprep.subr.bf16.mxu1 %v2786_v53 }
 0x119   :  { %1466 = vmatpush1.bf16.msra.mxu1 %v2784_v54 }
 0x11a   :  { %1467 = vmatprep.subr.bf16.mxu1 %v2789_v55 }
 0x11d   :  { %1468 = vmatpush1.bf16.msra.mxu1 %v2787_v56 }
 0x11e   :  { %1469 = vmatprep.subr.bf16.mxu1 %v2792_v57 }
 0x121   :  { %1470 = vmatpush1.bf16.msra.mxu1 %v2790_v11 }
 0x122   :  { %1471 = vmatprep.subr.bf16.mxu1 %v2795_v58 }
 0x125   :  { %1472 = vmatpush1.bf16.msra.mxu1 %v2793_v35  ;;  %v2861_v35 = vld [vmem:[#allocation8 + $0xc4] ss:$8 sps:$4 sm:$0xff]  }
 0x126   :  { %1473 = vmatprep.subr.bf16.mxu1 %v2798_v59  ;;  %v2859_v59 = vld [vmem:[#allocation8 + $0xc0] ss:$8 sps:$4 sm:$0xff]  }
 0x129   :  { %1474 = vmatpush1.bf16.msra.mxu1 %v2796_v60  ;;  %v2862_v60 = vld [vmem:[#allocation8 + $0xd0] ss:$8 sps:$4 sm:$0xff]  }
 0x12a   :  { %1475 = vmatprep.subr.bf16.mxu1 %v2801_v61  ;;  %v2864_v61 = vld [vmem:[#allocation8 + $0xd4] ss:$8 sps:$4 sm:$0xff]  }
 0x12d   :  { %1476 = vmatpush1.bf16.msra.mxu1 %v2799_v62  ;;  %v2867_v62 = vld [vmem:[#allocation8 + $0xe4] ss:$8 sps:$4 sm:$0xff]  }
 0x12e   :  { %1477 = vmatprep.subr.bf16.mxu1 %v2804_v63  ;;  %v2865_v63 = vld [vmem:[#allocation8 + $0xe0] ss:$8 sps:$4 sm:$0xff]  }
 0x131   :  { %1478 = vmatpush1.bf16.msra.mxu1 %v2802_v0  ;;  %v2870_v0 = vld [vmem:[#allocation8 + $0xf4] ss:$8 sps:$4 sm:$0xff]  }
 0x132   :  { %1479 = vmatprep.subr.bf16.mxu1 %v2807_v1  ;;  %v2868_v1 = vld [vmem:[#allocation8 + $0xf0] ss:$8 sps:$4 sm:$0xff]  }
 0x135   :  { %1480 = vmatpush1.bf16.msra.mxu1 %v2805_v2  ;;  %v2873_v2 = vld [vmem:[#allocation8 + $0x104] ss:$8 sps:$4 sm:$0xff]  }
 0x136   :  { %1481 = vmatprep.subr.bf16.mxu1 %v2810_v3  ;;  %v2919_v3 = vld [vmem:[#allocation9 + $0x40] sm:$0xff]  }
 0x139   :  { %1482 = vmatpush1.bf16.msra.mxu1 %v2808_v4  ;;  %v2920_v4 = vld [vmem:[#allocation9] sm:$0xff]  }
 0x13a   :  { %1483 = vmatprep.subr.bf16.mxu1 %v2813_v5  ;;  %v2921_v5 = vld [vmem:[#allocation9 + $0x48] sm:$0xff]  }
 0x13d   :  { %1484 = vmatpush1.bf16.msra.mxu1 %v2811_v6  ;;  %v2922_v6 = vld [vmem:[#allocation9 + $0x8] sm:$0xff]  }
 0x13e   :  { %1485 = vmatprep.subr.bf16.mxu1 %v2816_v7  ;;  %v2923_v7 = vld [vmem:[#allocation9 + $0x50] sm:$0xff]  }
 0x141   :  { %1486 = vmatpush1.bf16.msra.mxu1 %v2814_v9  ;;  %v2924_v9 = vld [vmem:[#allocation9 + $0x10] sm:$0xff]  }
 0x142   :  { %1487 = vmatprep.subr.bf16.mxu1 %v2819_v10  ;;  %v2925_v10 = vld [vmem:[#allocation9 + $0x58] sm:$0xff]  }
 0x145   :  { %1488 = vmatpush1.bf16.msra.mxu1 %v2817_v12  ;;  %v2926_v12 = vld [vmem:[#allocation9 + $0x18] sm:$0xff]  }
 0x146   :  { %1489 = vmatprep.subr.bf16.mxu1 %v2822_v13  ;;  %v2927_v13 = vld [vmem:[#allocation9 + $0x60] sm:$0xff]  }
 0x149   :  { %1490 = vmatpush1.bf16.msra.mxu1 %v2820_v14  ;;  %v2928_v14 = vld [vmem:[#allocation9 + $0x20] sm:$0xff]  }
 0x14a   :  { %2482 = vmatprep.subr.bf16.mxu1 %v2919_v3 }
 0x14c   :  { %1492 = vmatmul.mubr.bf16.vlgmr.msra.gmra.mrb[4].mxu1 %v3165_v15  ;;  %v2831_v15 = vld [vmem:[#allocation8 + $0x24] ss:$8 sps:$4 sm:$0xff]  }
 0x14d   :  { %1934 = vmatprep.subr.bf16.mxu0 %v2831_v15  ;;  %2483 = vmatpush3.bf16.msra.mxu1 %v2920_v4  ;;  %v2876_v15 = vld [vmem:[#allocation8 + $0x114] ss:$8 sps:$4 sm:$0xff]  }
 0x14e   :  { %1935 = vmatpush1.bf16.msra.mxu0 %v2829_v52  ;;  %2484 = vmatprep.subr.bf16.mxu1 %v2921_v5 }
 0x14f   :  { %1936 = vmatprep.subr.bf16.mxu0 %v2834_v29  ;;  %v2874_v29 = vld [vmem:[#allocation8 + $0x110] ss:$8 sps:$4 sm:$0xff]  }
 0x151   :  { %2485 = vmatpush3.bf16.msra.mxu1 %v2922_v6 }
 0x152   :  { %1937 = vmatpush1.bf16.msra.mxu0 %v2832_v30  ;;  %2486 = vmatprep.subr.bf16.mxu1 %v2923_v7  ;;  %v2879_v30 = vld [vmem:[#allocation8 + $0x124] ss:$8 sps:$4 sm:$0xff]  }
 0x153   :  { %1938 = vmatprep.subr.bf16.mxu0 %v2837_v31  ;;  %v2877_v31 = vld [vmem:[#allocation8 + $0x120] ss:$8 sps:$4 sm:$0xff]  }
 0x155   :  { %2487 = vmatpush3.bf16.msra.mxu1 %v2924_v9 }
 0x156   :  { %1939 = vmatpush1.bf16.msra.mxu0 %v2835_v32  ;;  %2488 = vmatprep.subr.bf16.mxu1 %v2925_v10  ;;  %v2885_v32 = vld [vmem:[#allocation8 + $0x144] ss:$8 sps:$4 sm:$0xff]  }
 0x157   :  { %1940 = vmatprep.subr.bf16.mxu0 %v2840_v33  ;;  %v2883_v33 = vld [vmem:[#allocation8 + $0x140] ss:$8 sps:$4 sm:$0xff]  }
 0x159   :  { %2489 = vmatpush3.bf16.msra.mxu1 %v2926_v12 }
 0x15a   :  { %1941 = vmatpush1.bf16.msra.mxu0 %v2838_v34  ;;  %2490 = vmatprep.subr.bf16.mxu1 %v2927_v13  ;;  %v2888_v34 = vld [vmem:[#allocation8 + $0x154] ss:$8 sps:$4 sm:$0xff]  }
 0x15b   :  { %1942 = vmatprep.subr.bf16.mxu0 %v2843_v36  ;;  %v2886_v36 = vld [vmem:[#allocation8 + $0x150] ss:$8 sps:$4 sm:$0xff]  }
 0x15d   :  { %2491 = vmatpush3.bf16.msra.mxu1 %v2928_v14 }
 0x15e   :  { %1943 = vmatpush1.bf16.msra.mxu0 %v2841_v37  ;;  %v2891_v37 = vld [vmem:[#allocation8 + $0x164] ss:$8 sps:$4 sm:$0xff]  }
 0x15f   :  { %v1288_v16 = vpop.f32.mrb[0].mxu1  ;;  %1944 = vmatprep.subr.bf16.mxu0 %v2846_v38  ;;  %v2889_v38 = vld [vmem:[#allocation8 + $0x160] ss:$8 sps:$4 sm:$0xff]  }
 0x160   :  { %v1290_v17 = vpop.f32.mrb[1].mxu1 }
 0x161   :  { %v1292_v18 = vpop.f32.mrb[2].mxu1 }
 0x162   :  { %v1293_v19 = vpop.f32.mrb[3].mxu1  ;;  %1945 = vmatpush1.bf16.msra.mxu0 %v2844_v39  ;;  %v2894_v39 = vld [vmem:[#allocation8 + $0x174] ss:$8 sps:$4 sm:$0xff]  }
 0x163   :  { %1946 = vmatprep.subr.bf16.mxu0 %v2849_v40  ;;  %v2892_v40 = vld [vmem:[#allocation8 + $0x170] ss:$8 sps:$4 sm:$0xff]  }
 0x166   :  { %1947 = vmatpush1.bf16.msra.mxu0 %v2847_v41  ;;  %v2897_v41 = vld [vmem:[#allocation8 + $0x184] ss:$8 sps:$4 sm:$0xff]  }
 0x167   :  { %1948 = vmatprep.subr.bf16.mxu0 %v2852_v42  ;;  %v2895_v42 = vld [vmem:[#allocation8 + $0x180] ss:$8 sps:$4 sm:$0xff]  }
 0x16a   :  { %1949 = vmatpush1.bf16.msra.mxu0 %v2850_v43  ;;  %v2900_v43 = vld [vmem:[#allocation8 + $0x194] ss:$8 sps:$4 sm:$0xff]  }
 0x16b   :  { %1950 = vmatprep.subr.bf16.mxu0 %v2855_v44  ;;  %v2898_v44 = vld [vmem:[#allocation8 + $0x190] ss:$8 sps:$4 sm:$0xff]  }
 0x16e   :  { %1951 = vmatpush1.bf16.msra.mxu0 %v2853_v45  ;;  %v2903_v45 = vld [vmem:[#allocation8 + $0x1a4] ss:$8 sps:$4 sm:$0xff]  }
 0x16f   :  { %1952 = vmatprep.subr.bf16.mxu0 %v2858_v46  ;;  %v2901_v46 = vld [vmem:[#allocation8 + $0x1a0] ss:$8 sps:$4 sm:$0xff]  }
 0x172   :  { %1953 = vmatpush1.bf16.msra.mxu0 %v2856_v47  ;;  %v2906_v47 = vld [vmem:[#allocation8 + $0x1b4] ss:$8 sps:$4 sm:$0xff]  }
 0x173   :  { %1954 = vmatprep.subr.bf16.mxu0 %v2861_v35  ;;  %v2932_v35 = vld [vmem:[#allocation9 + $0x30] sm:$0xff]  }
 0x176   :  { %1955 = vmatpush1.bf16.msra.mxu0 %v2859_v59  ;;  %v2933_v59 = vld [vmem:[#allocation9 + $0x78] sm:$0xff]  }
 0x177   :  { %1956 = vmatprep.subr.bf16.mxu0 %v2864_v61  ;;  %v1600_v61 = vlaneseq }
 0x17a   :  { %1957 = vmatpush1.bf16.msra.mxu0 %v2862_v60  ;;  %v2934_v60 = vld [vmem:[#allocation9 + $0x38] sm:$0xff]  }
 0x17b   :  { %1958 = vmatprep.subr.bf16.mxu0 %v2867_v62  ;;  %v1601_v62 = vshrl.u32 %v1600_v61, 7 }
 0x17e   :  { %1959 = vmatpush1.bf16.msra.mxu0 %v2865_v63  ;;  %v1602_v63 = vsub.s32 0, %v1601_v62 }
 0x17f   :  { %1960 = vmatprep.subr.bf16.mxu0 %v2870_v0  ;;  %v1598_v0 = vld [vmem:[%s3208_s3] sm:$0x3]  ;;  %s3065_s3 = smov [#allocation11]  }
 0x180   :  { %s2198_s26 = sshll.u32 %s3065_s3, 4  ;;  %s2199_s26 = int_to_ptr.vmem [resolvable:$true] %s2198_s26 }
 0x181   :  { %s3025_s27 = scalar_lea.vmem %s2199_s26, 128  ;;  %p3030_p5 = scmp.lt.s32.totalorder %s2199_s26, %s2199_s26 }
 0x182   :  { %1961 = vmatpush1.bf16.msra.mxu0 %v2868_v1  ;;  %v1606_v1 = vsub.s32 1, %v1601_v62  ;;  %p3026_p4 = scmp.ne.s32.totalorder %s2199_s26, %s3025_s27  ;;  %p3031_p6 = scmp.lt.s32.totalorder %s3025_s27, %s3025_s27 }
 0x183   :  { %1971 = vmatprep.subr.bf16.mxu0 %v2873_v2  ;;  %v1603_v2 = vrot.slane %v1598_v0, %v1602_v63 }
 0x184   :  { %v1607_v3 = vrot.slane %v1598_v0, %v1606_v1  ;;  %p3032_p7 = por %p3031_p6, %p3030_p5 }
 0x186   :  { %p3033_p8 = pnand %p3032_p7, %p3026_p4 }
 0x1a0   :  { %v1370_v20 = vpop.f32.mrb[0].mxu0 }
 0x1a1   :  { %v3173_v21 = vadd.f32 %v1370_v20, %v1288_v16  ;;  %v1372_v22 = vpop.f32.mrb[1].mxu0  ;;  %v2929_v16 = vld [vmem:[#allocation9 + $0x68] sm:$0xff]  }
 0x1a2   :  { %v3175_v23 = vadd.f32 %v1372_v22, %v1290_v17  ;;  %v1374_v24 = vpop.f32.mrb[2].mxu0  ;;  %v2930_v17 = vld [vmem:[#allocation9 + $0x28] sm:$0xff]   ;;  %2492 = vmatprep.subr.bf16.mxu1 %v2929_v16 }
 0x1a3   :  { %v1375_v25 = vpop.f32.mrb[3].mxu0  ;;  %v1515_v48 = vmul.f32 %v3173_v21, %v3173_v21  ;;  %2493 = vmatpush3.bf16.msra.mxu1 %v2930_v17 }
 0x1a4   :  { %v1516_v49 = vmul.f32 %v3175_v23, %v3175_v23 }
 0x1a6   :  { %v1519_v54 = vadd.f32 %v1516_v49, %v1515_v48  ;;  %v2904_v48 = vld [vmem:[#allocation8 + $0x1b0] ss:$8 sps:$4 sm:$0xff]   ;;  %v2909_v49 = vld [vmem:[#allocation8 + $0x1c4] ss:$8 sps:$4 sm:$0xff]  }
 0x21f   :  { %v1493_v50 = vpop.f32.mrb[4].mxu1 }
 0x220   :  { %v1517_v51 = vmul.f32 %v1493_v50, %v1493_v50  ;;  %v1495_v53 = vpop.f32.mrb[5].mxu1 }
 0x221   :  { %v1518_v55 = vmul.f32 %v1495_v53, %v1495_v53  ;;  %v1497_v56 = vpop.f32.mrb[6].mxu1 }
 0x222   :  { %v1498_v57 = vpop.f32.mrb[7].mxu1  ;;  %v1520_v11 = vadd.f32 %v1519_v54, %v1517_v51  ;;  %v2912_v51 = vld [vmem:[#allocation8 + $0x1d4] ss:$8 sps:$4 sm:$0xff]   ;;  %v2915_v54 = vld [vmem:[#allocation8 + $0x1e4] ss:$8 sps:$4 sm:$0xff]  }
 0x223   :  { %v2918_v56 = vld [vmem:[#allocation8 + $0x1f4] ss:$8 sps:$4 sm:$0xff]   ;;  %v2916_v57 = vld [vmem:[#allocation8 + $0x1f0] ss:$8 sps:$4 sm:$0xff]  }
 0x224   :  { %v1521_v58 = vadd.f32 %v1520_v11, %v1518_v55  ;;  %v2913_v55 = vld [vmem:[#allocation8 + $0x1e0] ss:$8 sps:$4 sm:$0xff]  }
 0x226   :  { %1522 = vadd.xlane.f32.xlu0 %v1521_v58  ;;  %v2931_v58 = vld [vmem:[#allocation9 + $0x70] sm:$0xff]  }
 0x227   :  { %2494 = vmatprep.subr.bf16.mxu1 %v2931_v58 }
 0x228   :  { %2495 = vmatpush3.bf16.msra.mxu1 %v2932_v35 }
 0x229   :  { %2496 = vmatprep.subr.bf16.mxu1 %v2933_v59 }
 0x22c   :  { %2497 = vmatpush3.bf16.msra.mxu1 %v2934_v60 }
 0x2b3   :  { %v1523_v18 = vpop.xlane.xlu0 %1522 }
 0x2b4   :  { %v1524_v19 = vadd.f32 1e-12, %v1523_v18  ;;  %v2465_v18 = vld [vmem:[%s3210_s5] ss:$0 sm:$0xff] }
 0x2b6   :  { %2935 = vrsqrt.f32 %v1524_v19 }
 0x2c0   :  { %v2936_v20 = vpop.eup %2935 }
 0x2c1   :  { %v1527_v22 = vmul.f32 %v2936_v20, %v3175_v23  ;;  %v1526_v24 = vmul.f32 %v2936_v20, %v3173_v21  ;;  %v1529_v25 = vmul.f32 %v2936_v20, %v1495_v53  ;;  %v3183_v26 = vmul.f32 %v2936_v20, %v1493_v50  ;;  %v2882_v23 = vld [vmem:[#allocation8 + $0x134] ss:$8 sps:$4 sm:$0xff]   ;;  %v2880_v21 = vld [vmem:[#allocation8 + $0x130] ss:$8 sps:$4 sm:$0xff]   ;;  %v2907_v50 = vld [vmem:[#allocation8 + $0x1c0] ss:$8 sps:$4 sm:$0xff]  }
 0x2c2   :  { %v2910_v53 = vld [vmem:[#allocation8 + $0x1d0] ss:$8 sps:$4 sm:$0xff]  }
 0x2c3   :  { %v1531_v27 = vpack.c.bf16 %v1527_v22, %v1527_v22  ;;  %v1530_v28 = vpack.c.bf16 %v1526_v24, %v1526_v24  ;;  %v1533_v52 = vpack.c.bf16 %v1529_v25, %v1529_v25  ;;  %v1532_v11 = vpack.c.bf16 %v3183_v26, %v3183_v26 }
 0x2c5   :  { %1962 = vmatprep.mubr.bf16.mxu0 %v1531_v27 }
 0x2c6   :  { %1963 = vmatmul.mubr.bf16.vlgmr.msra.gmra.mrb[4].mxu0 %v1530_v28 }
 0x2c7   :  { %1972 = vmatpush1.bf16.msra.mxu0 %v2871_v8  ;;  %2003 = vmatprep.mubr.bf16.mxu0 %v1533_v52 }
 0x2c8   :  { %1973 = vmatprep.subr.bf16.mxu0 %v2876_v15 }
 0x2cb   :  { %1974 = vmatpush1.bf16.msra.mxu0 %v2874_v29 }
 0x2cc   :  { %1975 = vmatprep.subr.bf16.mxu0 %v2879_v30 }
 0x2cf   :  { %1976 = vmatpush1.bf16.msra.mxu0 %v2877_v31 }
 0x2d0   :  { %1977 = vmatprep.subr.bf16.mxu0 %v2882_v23 }
 0x2d3   :  { %1978 = vmatpush1.bf16.msra.mxu0 %v2880_v21 }
 0x2d4   :  { %1979 = vmatprep.subr.bf16.mxu0 %v2885_v32 }
 0x2d7   :  { %1980 = vmatpush1.bf16.msra.mxu0 %v2883_v33 }
 0x2d8   :  { %1981 = vmatprep.subr.bf16.mxu0 %v2888_v34 }
 0x2db   :  { %1982 = vmatpush1.bf16.msra.mxu0 %v2886_v36 }
 0x2dc   :  { %1983 = vmatprep.subr.bf16.mxu0 %v2891_v37 }
 0x2df   :  { %1984 = vmatpush1.bf16.msra.mxu0 %v2889_v38 }
 0x2e0   :  { %1985 = vmatprep.subr.bf16.mxu0 %v2894_v39 }
 0x2e3   :  { %1986 = vmatpush1.bf16.msra.mxu0 %v2892_v40 }
 0x2e4   :  { %1987 = vmatprep.subr.bf16.mxu0 %v2897_v41 }
 0x2e7   :  { %1988 = vmatpush1.bf16.msra.mxu0 %v2895_v42 }
 0x2e8   :  { %1989 = vmatprep.subr.bf16.mxu0 %v2900_v43 }
 0x2eb   :  { %1990 = vmatpush1.bf16.msra.mxu0 %v2898_v44 }
 0x2ec   :  { %1991 = vmatprep.subr.bf16.mxu0 %v2903_v45 }
 0x2ef   :  { %1992 = vmatpush1.bf16.msra.mxu0 %v2901_v46 }
 0x2f0   :  { %1993 = vmatprep.subr.bf16.mxu0 %v2906_v47 }
 0x2f3   :  { %1994 = vmatpush1.bf16.msra.mxu0 %v2904_v48 }
 0x2f4   :  { %1995 = vmatprep.subr.bf16.mxu0 %v2909_v49 }
 0x2f7   :  { %1996 = vmatpush1.bf16.msra.mxu0 %v2907_v50 }
 0x2f8   :  { %1997 = vmatprep.subr.bf16.mxu0 %v2912_v51 }
 0x2fb   :  { %1998 = vmatpush1.bf16.msra.mxu0 %v2910_v53 }
 0x2fc   :  { %1999 = vmatprep.subr.bf16.mxu0 %v2915_v54 }
 0x2ff   :  { %2000 = vmatpush1.bf16.msra.mxu0 %v2913_v55 }
 0x300   :  { %2001 = vmatprep.subr.bf16.mxu0 %v2918_v56 }
 0x303   :  { %2002 = vmatpush1.bf16.msra.mxu0 %v2916_v57 }
 0x306   :  { %2004 = vmatmul.mubr.bf16.vlgmr.msra.gmra.mrb[4].mxu0 %v1532_v11 }
 0x3d9   :  { %v2005_v4 = vpop.f32.mrb[4].mxu0 }
 0x3da   :  { %v2506_v5 = vadd.f32 %v2005_v4, %v1603_v2  ;;  %v2007_v6 = vpop.f32.mrb[5].mxu0 }
 0x3db   :  { %v2507_v7 = vadd.f32 %v2007_v6, %v1607_v3  ;;  %v2009_v9 = vpop.f32.mrb[6].mxu0 }
 0x3dc   :  { %v2012_v10 = vmax.f32 %v2506_v5, 0.0  ;;  %v2010_v12 = vpop.f32.mrb[7].mxu0 }
 0x3dd   :  { %v2013_v13 = vmax.f32 %v2507_v7, 0.0 }
 0x3de   :  { %v2014_v16 = vpack.c.bf16 %v2012_v10, %v2012_v10 }
 0x3df   :  { %v2015_v14 = vpack.c.bf16 %v2013_v13, %v2013_v13 }
 0x3e1   :  { %2183 = vmatprep.mubr.bf16.mxu1 %v2015_v14 }
 0x3e2   :  { %2184 = vmatmul.mubr.bf16.vlgmr.msra.gmra.mrb[8].mxu1 %v2014_v16 }
 0x4b5   :  { %v2498_v17 = vpop.f32.mrb[8].mxu1 }
 0x4b6   :  { %v2499_v19 = vpop.f32.mrb[9].mxu1 }
 0x4b7   :  { %v2500_v20 = vadd.f32 %v2499_v19, %v2498_v17  ;;  %v2501_v22 = vpop.f32.mrb[10].mxu1 }
 0x4b8   :  { %v2502_v24 = vpop.f32.mrb[11].mxu1 }
 0x4b9   :  { %v2186_v25 = vadd.f32 %v2500_v20, %v2465_v18 }
 0x4bb   :  { %2191 = vst [vmem:[#allocation11] sm:$0xff] %v2186_v25 }
 0x4bc   :  { %3036 = shalt.err (!%p3033_p8)
}
 0x4bd   :  { %s3037_s5 = scalar_lea.hbm %s3211_s6, 128 }
 0x4be   :  { %p3038_p9 = scmp.ne.s32.totalorder %s3211_s6, %s3037_s5  ;;  %p3041_p10 = scmp.lt.u32.totalorder %s3037_s5, %s3211_s6 }
 0x4c0   :  { %p3043_p11 = pnand %p3041_p10, %p3038_p9 }
 0x4c2   :  { %3046 = shalt.err (!%p3043_p11)
}
 0x4c3   :  { %2201 = dma.vmem_to_hbm [thread:$0]  %s2199_s26, 128, %s3211_s6, [#allocation5]  }
 0x4c4   :  { %3053 = dma.done.wait [#allocation5], 128  }
 0x4c5   :  { %3054 = vsyncadd [#allocation5], 4294967168 }
 0x4c6   :  { %2205 = vsyncpa [#allocation4], 1 }
 0x4c7   :  { %2206 = vsyncpa [#allocation7], 1 }
 0x4c8   :  { %2207 = vsyncpa [#allocation10], 1 }
 0x4c9   :  { %2208 = vsyncpa [#allocation5], 1 }

</bundles_post_ra>
